<compile_context>
chip_gen: v7x
topology: tpu7x:2x2x1
jax: 0.10.0
libtpu: 0.0.40
codegen_flags: <defaults>
</compile_context>

<pallas_src>
import math

import jax
import jax.numpy as jnp
from jax.experimental import pallas as pl
from jax.experimental.pallas import tpu as pltpu


def _round_up(x: int, m: int) -> int:
    return (x + m - 1) // m * m


def _gamma_division_kernel(c_ref, g_ref, o_ref):
    # Single broadcast multiply.  g is a resident (1, W) f32 row, so for
    # sub-f32 inputs the multiply runs in f32 and is cast back (documented
    # precision: slightly tighter than a native low-precision multiply).
    o_ref[...] = (c_ref[...] * g_ref[...]).astype(o_ref.dtype)


def _pick_vectors_per_fused_row(B: int, D: int) -> int:
    """Pick R | B so the fused row width W = R*D is lane-dense.

    Preference: W % 128 == 0 (unmasked stores, smallest such R to keep many
    rows for grid parallelism), else maximize lane density W/ceil128(W), else
    widest.  Pure trace-time integer search; the reshape it enables is a free
    view of contiguous data (no transpose, no pad).
    """
    max_r = min(B, 1024, max(1, 32768 // D))
    best_r, best_key = 1, (-1, -1.0, -float("inf"))
    for r in range(1, max_r + 1):
        if B % r:
            continue
        w = r * D
        dense = 1 if w % 128 == 0 else 0
        density = w / _round_up(w, 128)
        # among fully dense widths prefer the narrowest (more rows -> more
        # grid steps); among sparse widths prefer denser, then wider.
        key = (dense, density, (-w if dense else w))
        if key > best_key:
            best_key, best_r = key, r
    return best_r


def gamma_division(
    c: jax.Array, gamma: float, *, target_block_bytes: int = 4 << 20
) -> jax.Array:
    """Pallas implementation of GammaDivision.forward (c * g), single HBM pass."""
    if gamma == 0:
        raise ValueError("gamma must be nonzero")

    orig_shape = c.shape
    D = orig_shape[-1]                       # cep_order + 1
    dtype = c.dtype
    itemsize = jnp.dtype(dtype).itemsize
    N = math.prod(orig_shape)
    B = N // D                               # number of cepstral vectors

    # Lane-dense fused view: (rows, W) with W = R*D, R | B.  Free reshape.
    R = _pick_vectors_per_fused_row(B, D)
    W = R * D
    rows = B // R
    flat = c.reshape(rows, W)

    # g tiled across one fused row; c0 positions (every D-th lane) pass through.
    g_row = jnp.full((1, W), 1.0 / float(gamma), dtype=jnp.float32)
    g_row = g_row.at[:, ::D].set(1.0)

    # Block sizing by useful bytes.  in+out double-buffered => ~4x block bytes
    # of VMEM plus the tiny resident g row; vmem_limit below gives headroom on
    # every generation (v7x physical VMEM is 64 MiB).
    sublane = max(8, 32 // itemsize)         # f32: 8, bf16: 16, int8/fp8: 32
    row_bytes = W * itemsize
    max_rows = max(sublane, (target_block_bytes // row_bytes) // sublane * sublane)

    n_steps = pl.cdiv(rows, max_rows)
    if rows >= 2 * sublane:
        n_steps = max(n_steps, 2)            # keep both v7x TensorCores streaming
    tile_rows = min(rows, _round_up(pl.cdiv(rows, n_steps), sublane))
    grid = (pl.cdiv(rows, tile_rows),)       # partial edge block masked by Pallas

    out = pl.pallas_call(
        _gamma_division_kernel,
        out_shape=jax.ShapeDtypeStruct((rows, W), dtype),
        grid=grid,
        in_specs=[
            pl.BlockSpec((tile_rows, W), lambda i: (i, 0)),
            pl.BlockSpec((1, W), lambda i: (0, 0)),   # resident g, fetched once
        ],
        out_specs=pl.BlockSpec((tile_rows, W), lambda i: (i, 0)),
        compiler_params=pltpu.CompilerParams(
            dimension_semantics=("parallel",),        # megacore sharding on v7x
            vmem_limit_bytes=32 << 20,
        ),
    )(flat, g_row)

    return out.reshape(orig_shape)


if __name__ == "__main__":
    cep_order = 24                 # -> D = 25 cepstral coefficients
    D = cep_order + 1
    gamma = -0.5
    g_ref = jnp.full((D,), 1.0 / gamma, dtype=jnp.float32).at[0].set(1.0)

    # Small shape consistent with the module: (batch, frames, cep_order+1).
    c = jax.random.normal(jax.random.PRNGKey(0), (2, 8, D), dtype=jnp.float32)
    out = jax.block_until_ready(gamma_division(c, gamma))
    assert out.shape == c.shape and out.dtype == c.dtype
    assert jnp.allclose(out, c * g_ref, atol=1e-6, rtol=1e-6)

    # Lane-dense path: B = 3840 -> fused rows of 128 vectors (W = 3200 lanes),
    # 30 rows; small block target forces a multi-step grid + masked edge block.
    c2 = jax.random.normal(jax.random.PRNGKey(1), (3, 1280, D), dtype=jnp.float32)
    out2 = jax.block_until_ready(gamma_division(c2, gamma, target_block_bytes=96 * 1024))
    assert jnp.allclose(out2, c2 * g_ref, atol=1e-6, rtol=1e-6)

    # Awkward batch (prime B=7): widest copy-free fused row, still one pass.
    c3 = jax.random.normal(jax.random.PRNGKey(2), (7, D), dtype=jnp.float32)
    out3 = jax.block_until_ready(gamma_division(c3, gamma))
    assert jnp.allclose(out3, c3 * g_ref, atol=1e-6, rtol=1e-6)

    # bf16 path (multiply in f32, cast back).
    c4 = jax.random.normal(jax.random.PRNGKey(3), (2, 64, D), dtype=jnp.bfloat16)
    out4 = jax.block_until_ready(gamma_division(c4, gamma))
    ref4 = (c4.astype(jnp.float32) * g_ref).astype(jnp.bfloat16)
    assert out4.dtype == jnp.bfloat16
    assert jnp.allclose(out4.astype(jnp.float32), ref4.astype(jnp.float32),
                        atol=1e-2, rtol=1e-2)

    print("KERNEL_OK")
</pallas_src>

<mosaic_0001>
module attributes {stable_mosaic.version = 11 : i64} {
  func.func @_gamma_division_kernel(%arg0: i32, %arg1: memref<1x400xf32, #tpu.memory_space<vmem>>, %arg2: memref<1x400xf32, #tpu.memory_space<vmem>>, %arg3: memref<1x400xf32, #tpu.memory_space<vmem>>) attributes {dimension_semantics = [#tpu.dimension_semantics<parallel>], iteration_bounds = array<i64: 1>, scalar_prefetch = 0 : i64, scratch_operands = 0 : i64, tpu.core_type = #tpu.core_type<tc>, window_params = [{transform_indices = @transform_0, window_bounds = array<i64: 1, 400>}, {pipeline_mode = #tpu.pipeline_mode<synchronous>, transform_indices = @transform_1, window_bounds = array<i64: 1, 400>}, {transform_indices = @transform_2, window_bounds = array<i64: 1, 400>}]} {
    %c0 = arith.constant 0 : index
    %c0_0 = arith.constant 0 : index
    %0 = vector.load %arg1[%c0, %c0_0] : memref<1x400xf32, #tpu.memory_space<vmem>>, vector<1x400xf32>
    %c0_1 = arith.constant 0 : index
    %c0_2 = arith.constant 0 : index
    %1 = vector.load %arg2[%c0_1, %c0_2] : memref<1x400xf32, #tpu.memory_space<vmem>>, vector<1x400xf32>
    %2 = arith.mulf %0, %1 : vector<1x400xf32>
    %c0_3 = arith.constant 0 : index
    %c0_4 = arith.constant 0 : index
    %3 = vector.load %arg3[%c0_3, %c0_4] : memref<1x400xf32, #tpu.memory_space<vmem>>, vector<1x400xf32>
    tpu.vector_store %arg3[%c0_3, %c0_4], %2 {strides = array<i32>} : memref<1x400xf32, #tpu.memory_space<vmem>>, vector<1x400xf32>,
    return
  }
  func.func @transform_0(%arg0: i32) -> (i32, i32) {
    %c0_i32 = arith.constant 0 : i32
    %c0_i32_0 = arith.constant 0 : i32
    return %arg0, %c0_i32 : i32, i32
  }
  func.func @transform_1(%arg0: i32) -> (i32, i32) {
    %c0_i32 = arith.constant 0 : i32
    %c0_i32_0 = arith.constant 0 : i32
    %c0_i32_1 = arith.constant 0 : i32
    return %c0_i32, %c0_i32_0 : i32, i32
  }
  func.func @transform_2(%arg0: i32) -> (i32, i32) {
    %c0_i32 = arith.constant 0 : i32
    %c0_i32_0 = arith.constant 0 : i32
    return %arg0, %c0_i32 : i32, i32
  }
}

</mosaic_0001>

<bundles_post_ra>
// kernel: tpu_custom_call.1
= control target key start
LH: loop header
LB: loop body
LE: loop exit
PB: predicated region body
PF: predicated region fallthrough
CT: control target
= control target key end

     0   :  { %7 = vsyncpa [#allocation3], 0  ;;  %s189_s0 = inlined_call_operand.hbm [shape: f32[1,400], index: 0, kind: input, shape index: {}]   ;;  %s190_s1 = inlined_call_operand.hbm [shape: f32[1,400], index: 1, kind: input, shape index: {}]   ;;  %s191_s2 = inlined_call_operand.hbm [shape: f32[1,400], index: 2, kind: output, shape index: {}]  }
   0x1   :  { %8 = vsyncpa [#allocation6], 0 }
   0x2   :  { %9 = vsyncpa [#allocation4], 0  ;;  %s135_s9 = smov [#allocation2]   ;;  %s136_s11 = smov [#allocation5]  }
   0x3   :  { %s16_s10 = sshll.u32 %s135_s9, 4  ;;  %s26_s12 = sshll.u32 %s136_s11, 4  ;;  %s17_s10 = int_to_ptr.vmem [resolvable:$true] %s16_s10  ;;  %s27_s12 = int_to_ptr.vmem [resolvable:$true] %s26_s12 }
   0x4   :  { %s63_s15 = scalar_lea.hbm %s189_s0, 64 }
   0x5   :  { %p64_p0 = scmp.ne.s32.totalorder %s189_s0, %s63_s15  ;;  %p67_p1 = scmp.lt.u32.totalorder %s63_s15, %s189_s0 }
   0x7   :  { %p69_p2 = pnand %p67_p1, %p64_p0 }
   0x9   :  { %72 = shalt.err (!%p69_p2)
}
   0xa   :  { %s73_s20 = scalar_lea.vmem %s17_s10, 64  ;;  %p78_p4 = scmp.lt.s32.totalorder %s17_s10, %s17_s10 }
   0xb   :  { %p74_p3 = scmp.ne.s32.totalorder %s17_s10, %s73_s20  ;;  %p79_p5 = scmp.lt.s32.totalorder %s73_s20, %s73_s20 }
   0xd   :  { %p80_p6 = por %p79_p5, %p78_p4 }
   0xf   :  { %p81_p7 = pnand %p80_p6, %p74_p3 }
  0x11   :  { %84 = shalt.err (!%p81_p7)
}
  0x12   :  { %19 = dma.hbm_to_vmem [thread:$0]  %s189_s0, 64, %s17_s10, [#allocation3]  }
  0x13   :  { %s85_s25 = scalar_lea.hbm %s190_s1, 64 }
  0x14   :  { %p86_p8 = scmp.ne.s32.totalorder %s190_s1, %s85_s25  ;;  %p89_p9 = scmp.lt.u32.totalorder %s85_s25, %s190_s1 }
  0x16   :  { %p91_p10 = pnand %p89_p9, %p86_p8 }
  0x18   :  { %94 = shalt.err (!%p91_p10)
}
  0x19   :  { %s95_s30 = scalar_lea.vmem %s27_s12, 64  ;;  %p100_p12 = scmp.lt.s32.totalorder %s27_s12, %s27_s12 }
  0x1a   :  { %p96_p11 = scmp.ne.s32.totalorder %s27_s12, %s95_s30  ;;  %p101_p13 = scmp.lt.s32.totalorder %s95_s30, %s95_s30 }
  0x1c   :  { %p102_p0 = por %p101_p13, %p100_p12 }
  0x1e   :  { %p103_p1 = pnand %p102_p0, %p96_p11 }
  0x20   :  { %106 = shalt.err (!%p103_p1)
}
  0x21   :  { %29 = dma.hbm_to_vmem [thread:$0]  %s190_s1, 64, %s27_s12, [#allocation6]  }
  0x22   :  { %129 = dma.done.wait [#allocation3], 64  }
  0x23   :  { %130 = vsyncadd [#allocation3], 4294967232 }
  0x24   :  { %131 = dma.done.wait [#allocation6], 64  }
  0x25   :  { %132 = vsyncadd [#allocation6], 4294967232  ;;  %v39_v0 = vlaneseq  ;;  %s137_s4 = smov [#allocation7]   ;;  %v36_v1 = vld [vmem:[#allocation2] sm:$0xf] }
  0x26   :  { %s50_s5 = sshll.u32 %s137_s4, 4  ;;  %v37_v2 = vld [vmem:[#allocation5] sm:$0xf]  ;;  %s51_s5 = int_to_ptr.vmem [resolvable:$true] %s50_s5 }
  0x27   :  { %vm41_vm0 = vcmp.lt.s32.totalorder %v39_v0, 400  ;;  %v38_v3 = vmul.f32 %v37_v2, %v36_v1  ;;  %s107_s6 = scalar_lea.vmem %s51_s5, 64  ;;  %p112_p3 = scmp.lt.s32.totalorder %s51_s5, %s51_s5 }
  0x28   :  { %p108_p2 = scmp.ne.s32.totalorder %s51_s5, %s107_s6  ;;  %p113_p4 = scmp.lt.s32.totalorder %s107_s6, %s107_s6 }
  0x29   :  { %43 = vst.msk [vmem:[#allocation7] sm:$0xf] %vm41_vm0, %v38_v3 }
  0x2a   :  { %p114_p5 = por %p113_p4, %p112_p3 }
  0x2c   :  { %p115_p6 = pnand %p114_p5, %p108_p2 }
  0x2e   :  { %118 = shalt.err (!%p115_p6)
}
  0x2f   :  { %s119_s8 = scalar_lea.hbm %s191_s2, 64 }
  0x30   :  { %p120_p7 = scmp.ne.s32.totalorder %s191_s2, %s119_s8  ;;  %p123_p8 = scmp.lt.u32.totalorder %s119_s8, %s191_s2 }
  0x32   :  { %p125_p9 = pnand %p123_p8, %p120_p7 }
  0x34   :  { %128 = shalt.err (!%p125_p9)
}
  0x35   :  { %53 = dma.vmem_to_hbm [thread:$0]  %s51_s5, 64, %s191_s2, [#allocation4]  }
  0x36   :  { %133 = dma.done.wait [#allocation4], 64  }
  0x37   :  { %134 = vsyncadd [#allocation4], 4294967232 }
  0x38   :  { %57 = vsyncpa [#allocation3], 1 }
  0x39   :  { %58 = vsyncpa [#allocation6], 1 }
  0x3a   :  { %59 = vsyncpa [#allocation4], 1 }

</bundles_post_ra>
